<compile_context>
chip_gen: v5e
topology: v5e:2x2
jax: 0.10.0
libtpu: 0.0.40
codegen_flags: <defaults>
</compile_context>

<pallas_src>
import numpy as np
import jax
import jax.numpy as jnp
from jax.experimental import pallas as pl
from jax.experimental.pallas import tpu as pltpu

HIDDEN = 32            # stand-in for BERT hidden size 768
SPAN_TOKEN_ID = 30522  # special span-marker token id (same as the PyTorch code)
VOCAB = 30523
NUM_RELATIONS = 2      # RGCNConv(768, 768, 2)
TAU = 0.2
MAX_SEQ = 64           # positional-embedding table size of the stand-in encoder
VMEM_LIMIT = 32 * 1024 * 1024   # >= v5e's 16MiB scoped default; <= v6e/v7x defaults


def _col_tile(n_pad):
    """Largest of {512, 256, 128} dividing n_pad (n_pad is a multiple of 128)."""
    for t in (512, 256, 128):
        if n_pad % t == 0:
            return t
    return 128


# --------------------------------------------------------------------------
# BERT stand-in encoder hot path, transposed/lane-dense:
#   hidden^T (H, rows_pad) = tanh(W_enc^T (H,H) @ emb^T (H, rows_pad) + b)
# Grid over lane (token-row) tiles; weights resident; bf16 MXU, f32 accumulate.
# --------------------------------------------------------------------------
def encoder_kernel(embt_ref, w_ref, b_ref, out_ref):
    h = jnp.dot(w_ref[...], embt_ref[...], preferred_element_type=jnp.float32)
    out_ref[...] = jnp.tanh(h + b_ref[...]).astype(out_ref.dtype)   # f32 epilogue, bf16 store


def run_encoder_t(emb_t, w_enc_t, b_enc):
    """emb_t: (H, rows_pad) bf16 -> (H, rows_pad) bf16 hidden states (transposed)."""
    h, rows_pad = emb_t.shape
    te = _col_tile(rows_pad)
    return pl.pallas_call(
        encoder_kernel,
        out_shape=jax.ShapeDtypeStruct((h, rows_pad), jnp.bfloat16),
        grid_spec=pltpu.PrefetchScalarGridSpec(
            num_scalar_prefetch=0,
            grid=(rows_pad // te,),
            in_specs=[pl.BlockSpec((h, te), lambda j: (0, j)),     # emb^T tile
                      pl.BlockSpec((h, h), lambda j: (0, 0)),      # W_enc^T (resident)
                      pl.BlockSpec((h, 1), lambda j: (0, 0))],     # bias (H,1)
            out_specs=pl.BlockSpec((h, te), lambda j: (0, j))),
        compiler_params=pltpu.CompilerParams(
            dimension_semantics=("parallel",),                     # megacore on v7x
            vmem_limit_bytes=VMEM_LIMIT),
    )(emb_t, w_enc_t, b_enc)


# --------------------------------------------------------------------------
# RGCN layer in transposed layout, one output-node (lane) column tile per step:
#   tmp  = [W0^T; W1^T] (2H,H) @ x^T (H,N_pad)                (packed weights)
#   agg  = tmp0 @ A0^T[:, tile] + tmp1 @ A1^T[:, tile]        (two accumulated
#                                                              dots, no concat)
#   out  = agg + Wroot^T @ x^T[:, tile] + b
# The (H, N_pad) feature slab is resident; only the O(N^2) adjacency streams.
# --------------------------------------------------------------------------
def _rgcn_tile(xt_full_ref, xt_tile_ref, at_ref, wp_ref, wroot_ref, b_ref):
    H = HIDDEN
    n_src = at_ref.shape[0] // 2                               # = N_pad (source nodes)
    # (1) packed per-relation weight matmul over ALL source nodes (tiny, recomputed
    #     per tile so grid steps stay independent -> "parallel" semantics).
    tmp = jnp.dot(wp_ref[...], xt_full_ref[...],
                  preferred_element_type=jnp.float32)          # (2H, N_pad) f32
    tmp_bf = tmp.astype(jnp.bfloat16)
    # (2) relation aggregation: two sublane-sliced, accumulated dots (no lane concat).
    agg = jnp.dot(tmp_bf[0:H, :], at_ref[0:n_src, :],
                  preferred_element_type=jnp.float32)          # (H, TN) f32
    agg = agg + jnp.dot(tmp_bf[H:2 * H, :], at_ref[n_src:2 * n_src, :],
                        preferred_element_type=jnp.float32)
    # (3) root/self term for this output tile only.
    root = jnp.dot(wroot_ref[...], xt_tile_ref[...],
                   preferred_element_type=jnp.float32)         # (H, TN) f32
    return agg + root + b_ref[...]                             # bias (H,1) bcast on lanes


def rgcn_layer_kernel(xt_full_ref, xt_tile_ref, at_ref, wp_ref, wroot_ref,
                      b_ref, out_ref):
    out_ref[...] = _rgcn_tile(xt_full_ref, xt_tile_ref, at_ref,
                              wp_ref, wroot_ref, b_ref).astype(out_ref.dtype)


def rgcn_cls_kernel(xt_full_ref, xt_tile_ref, at_ref, wp_ref, wroot_ref,
                    b_ref, wcls_ref, bcls_ref, out_ref):
    h2 = _rgcn_tile(xt_full_ref, xt_tile_ref, at_ref, wp_ref, wroot_ref, b_ref)
    # classifier = Linear(H,1) + Sigmoid as VPU multiply + sublane reduce
    # (frees the MXU), directly producing a lane-dense (1, TN) result.
    logits = jnp.sum(h2 * wcls_ref[...], axis=0, keepdims=True) + bcls_ref[...]
    out_ref[...] = jnp.exp(jax.nn.sigmoid(logits) * (1.0 / TAU))   # exp(score / tau)


def run_rerank(x_t, a_stack_t, params, n_nodes):
    """x_t: (H, N_pad) bf16 node features (transposed);
       a_stack_t: (2*N_pad, N_pad) bf16 = [A0^T ; A1^T] (mean-normalized)."""
    H = HIDDEN
    n_pad = x_t.shape[1]
    tn = _col_tile(n_pad)
    grid = (n_pad // tn,)
    cparams = pltpu.CompilerParams(
        dimension_semantics=("parallel",),                     # megacore on v7x
        vmem_limit_bytes=VMEM_LIMIT)

    def common_specs():
        return [pl.BlockSpec((H, n_pad), lambda j: (0, 0)),        # x^T resident (all sources)
                pl.BlockSpec((H, tn), lambda j: (0, j)),           # x^T tile (root term)
                pl.BlockSpec((2 * n_pad, tn), lambda j: (0, j))]   # streamed adjacency tile

    def w_spec(arr):
        return pl.BlockSpec(arr.shape, lambda j: (0, 0))

    # ---- RGCN layer 1 -> h1 (H, N_pad) bf16 ----
    h1 = pl.pallas_call(
        rgcn_layer_kernel,
        out_shape=jax.ShapeDtypeStruct((H, n_pad), jnp.bfloat16),
        grid_spec=pltpu.PrefetchScalarGridSpec(
            num_scalar_prefetch=0, grid=grid,
            in_specs=common_specs() + [w_spec(params["wp1"]),
                                       w_spec(params["wroot1"]),
                                       w_spec(params["b1"])],
            out_specs=pl.BlockSpec((H, tn), lambda j: (0, j))),
        compiler_params=cparams,
    )(x_t, x_t, a_stack_t, params["wp1"], params["wroot1"], params["b1"])

    # ---- RGCN layer 2 + Linear(H,1) + Sigmoid + exp(./tau) -> (1, N_pad) f32 ----
    scores = pl.pallas_call(
        rgcn_cls_kernel,
        out_shape=jax.ShapeDtypeStruct((1, n_pad), jnp.float32),
        grid_spec=pltpu.PrefetchScalarGridSpec(
            num_scalar_prefetch=0, grid=grid,
            in_specs=common_specs() + [w_spec(params["wp2"]),
                                       w_spec(params["wroot2"]),
                                       w_spec(params["b2"]),
                                       w_spec(params["w_cls"]),
                                       w_spec(params["b_cls"])],
            out_specs=pl.BlockSpec((1, tn), lambda j: (0, j))),
        compiler_params=cparams,
    )(h1, h1, a_stack_t, params["wp2"], params["wroot2"], params["b2"],
      params["w_cls"], params["b_cls"])

    return scores[0, :n_nodes]                  # exp(sigmoid(.)/tau) per real node


# --------------------------------------------------------------------------
# Host-side preprocessing (runs on host data before any device dispatch).
# --------------------------------------------------------------------------
def build_stacked_adjacency_t(edge_index, edge_type, num_nodes, n_pad):
    """Dense mean-normalized adjacency, pre-stacked & transposed:
       out[r*n_pad + j, i] = A_r[i, j]   (A_r = D^-1 A, PyG RGCNConv aggr='mean')."""
    src = np.asarray(edge_index[0])
    dst = np.asarray(edge_index[1])
    et = np.asarray(edge_type)
    out = np.zeros((NUM_RELATIONS * n_pad, n_pad), np.float32)
    for r in range(NUM_RELATIONS):
        m = et == r
        a = np.zeros((num_nodes, num_nodes), np.float32)
        np.add.at(a, (dst[m], src[m]), 1.0)
        a = a / np.maximum(a.sum(axis=-1, keepdims=True), 1.0)
        out[r * n_pad:r * n_pad + num_nodes, :num_nodes] = a.T
    return jnp.asarray(out, dtype=jnp.bfloat16)


# --------------------------------------------------------------------------
# Device path (jittable: all shapes static, no host sync between kernels).
# --------------------------------------------------------------------------
@jax.jit
def _device_forward(doc_ids, pas_ids, node_cols, a_stack_t, params):
    b_doc, s = doc_ids.shape
    b_pas, _ = pas_ids.shape
    rows = (b_doc + b_pas) * s
    rows_pad = max(128, -(-rows // 128) * 128)           # lane-aligned token pad

    # one fused, transposed encoder launch for doc title + passages
    ids = jnp.concatenate([doc_ids, pas_ids], axis=0)
    emb = params["tok_emb"][ids] + params["pos_emb"][None, :s, :]    # (B, S, H) f32
    emb_t = emb.reshape(rows, HIDDEN).T.astype(jnp.bfloat16)         # (H, rows) bf16
    emb_pad = jnp.zeros((HIDDEN, rows_pad), jnp.bfloat16).at[:, :rows].set(emb_t)
    hidden_t = run_encoder_t(emb_pad, params["w_enc_t"], params["b_enc"])
    # dropout: eval mode -> identity

    # Gather node columns (doc CLS | passage CLS | span tokens) directly in the
    # lane-dense transposed layout -- no transpose between the two kernels.
    x_nodes_t = hidden_t[:, node_cols]                   # (H, n_nodes) bf16
    n_nodes = node_cols.shape[0]
    n_pad = a_stack_t.shape[1]
    x_t = jnp.zeros((HIDDEN, n_pad), jnp.bfloat16).at[:, :n_nodes].set(x_nodes_t)

    return run_rerank(x_t, a_stack_t, params, n_nodes)   # (n_nodes,) f32


def structure_rerank_forward(document_title_input_ids, passages_input_ids,
                             edge_index, edge_type, params):
    # Span indices, node->token column map and the dense adjacency are computed
    # from HOST data up front, so no device->host sync sits between kernels.
    doc_np = np.asarray(document_title_input_ids)
    pas_np = np.asarray(passages_input_ids)
    b_doc, s = doc_np.shape
    b_pas, s2 = pas_np.shape
    assert s == s2 and s <= MAX_SEQ, "sequence length exceeds positional table"

    span_b, span_p = np.nonzero(pas_np == SPAN_TOKEN_ID)   # row-major == torch.where order
    n_span = int(span_b.shape[0])
    n_nodes = b_doc + b_pas + n_span
    n_pad = max(128, int(-(-n_nodes // 128) * 128))         # lane-aligned node pad

    doc_cols = np.arange(b_doc) * s                          # CLS of title(s)
    pas_cols = (b_doc + np.arange(b_pas)) * s                # CLS of each passage
    span_cols = (b_doc + span_b) * s + span_p                # span-marker tokens
    node_cols = np.concatenate([doc_cols, pas_cols, span_cols]).astype(np.int32)

    a_stack_t = build_stacked_adjacency_t(edge_index, edge_type, n_nodes, n_pad)

    scores = _device_forward(jnp.asarray(doc_np, dtype=jnp.int32),
                             jnp.asarray(pas_np, dtype=jnp.int32),
                             jnp.asarray(node_cols), a_stack_t, params)
    # x[-len(span_feature):] -- explicit bounds handle the zero-span edge case.
    return scores[n_nodes - n_span:n_nodes]


# --------------------------------------------------------------------------
# Parameters (RGCN weights pre-packed & transposed for the kernel layout).
# --------------------------------------------------------------------------
def init_params(key):
    ks = jax.random.split(key, 14)

    def g(k, shape, scale=0.05):
        return scale * jax.random.normal(k, shape, dtype=jnp.float32)

    w_enc = g(ks[2], (HIDDEN, HIDDEN))
    w_root1, w0_1, w1_1 = g(ks[4], (HIDDEN, HIDDEN)), g(ks[5], (HIDDEN, HIDDEN)), g(ks[6], (HIDDEN, HIDDEN))
    w_root2, w0_2, w1_2 = g(ks[8], (HIDDEN, HIDDEN)), g(ks[9], (HIDDEN, HIDDEN)), g(ks[10], (HIDDEN, HIDDEN))

    return {
        "tok_emb": g(ks[0], (VOCAB, HIDDEN), 0.02),
        "pos_emb": g(ks[1], (MAX_SEQ, HIDDEN), 0.02),
        # encoder stand-in, pre-transposed for the (H, rows) lane-dense layout
        "w_enc_t": w_enc.T.astype(jnp.bfloat16),
        "b_enc":   g(ks[3], (HIDDEN, 1)),
        # RGCNConv layer 1: packed [W0^T; W1^T] (2H,H) + root (H,H) bf16, bias (H,1)
        "wp1":    jnp.concatenate([w0_1.T, w1_1.T], axis=0).astype(jnp.bfloat16),
        "wroot1": w_root1.T.astype(jnp.bfloat16),
        "b1":     g(ks[7], (HIDDEN, 1)),
        # RGCNConv layer 2
        "wp2":    jnp.concatenate([w0_2.T, w1_2.T], axis=0).astype(jnp.bfloat16),
        "wroot2": w_root2.T.astype(jnp.bfloat16),
        "b2":     g(ks[11], (HIDDEN, 1)),
        # classifier: Linear(H, 1) + Sigmoid
        "w_cls": g(ks[12], (HIDDEN, 1)),
        "b_cls": g(ks[13], (1, 1)),
    }


if __name__ == "__main__":
    params = init_params(jax.random.PRNGKey(0))

    B_doc, B_pass, S = 1, 2, 8
    kd, kp = jax.random.split(jax.random.PRNGKey(1), 2)
    document_title_input_ids = np.asarray(
        jax.random.randint(kd, (B_doc, S), 0, 1000)).copy()
    passages_np = np.asarray(
        jax.random.randint(kp, (B_pass, S), 0, 1000)).copy()   # writable copy
    # insert span-marker tokens (id 30522): 1 in passage 0, 2 in passage 1 -> 3 spans
    passages_np[0, 3] = SPAN_TOKEN_ID
    passages_np[1, 2] = SPAN_TOKEN_ID
    passages_np[1, 5] = SPAN_TOKEN_ID

    # graph: node 0 = doc title, nodes 1-2 = passages, nodes 3-5 = spans
    # relation 0 = title<->passage, relation 1 = passage<->span
    edge_index = np.array([[0, 0, 1, 2, 1, 1, 2, 3, 4, 5],
                           [1, 2, 0, 0, 3, 4, 5, 1, 1, 2]], dtype=np.int32)
    edge_type = np.array([0, 0, 0, 0, 1, 1, 1, 1, 1, 1], dtype=np.int32)

    span_score = structure_rerank_forward(
        document_title_input_ids, passages_np, edge_index, edge_type, params)
    jax.block_until_ready(span_score)

    assert span_score.shape == (3,)
    assert bool(jnp.all(jnp.isfinite(span_score)))
    print("KERNEL_OK")
</pallas_src>

<mosaic_0001>
module attributes {stable_mosaic.version = 11 : i64} {
  func.func @encoder_kernel(%arg0: i32, %arg1: memref<32x128xbf16, #tpu.memory_space<vmem>>, %arg2: memref<32x32xbf16, #tpu.memory_space<vmem>>, %arg3: memref<32x1xf32, #tpu.memory_space<vmem>>, %arg4: memref<32x128xbf16, #tpu.memory_space<vmem>>) attributes {dimension_semantics = [#tpu.dimension_semantics<parallel>], iteration_bounds = array<i64: 1>, scalar_prefetch = 0 : i64, scratch_operands = 0 : i64, tpu.core_type = #tpu.core_type<tc>, window_params = [{transform_indices = @transform_0, window_bounds = array<i64: 32, 128>}, {pipeline_mode = #tpu.pipeline_mode<synchronous>, transform_indices = @transform_1, window_bounds = array<i64: 32, 32>}, {pipeline_mode = #tpu.pipeline_mode<synchronous>, transform_indices = @transform_2, window_bounds = array<i64: 32, 1>}, {transform_indices = @transform_3, window_bounds = array<i64: 32, 128>}]} {
    %c0 = arith.constant 0 : index
    %c0_0 = arith.constant 0 : index
    %0 = vector.load %arg2[%c0, %c0_0] : memref<32x32xbf16, #tpu.memory_space<vmem>>, vector<32x32xbf16>
    %c0_1 = arith.constant 0 : index
    %c0_2 = arith.constant 0 : index
    %1 = vector.load %arg1[%c0_1, %c0_2] : memref<32x128xbf16, #tpu.memory_space<vmem>>, vector<32x128xbf16>
    %cst = arith.constant dense<0.000000e+00> : vector<32x128xf32>
    %2 = tpu.matmul %0, %1, %cst {dimension_numbers = #tpu.dot_dimension_numbers<[1], [0], [0], [1], [0, 0, 1, 1], [], []>} : vector<32x32xbf16>, vector<32x128xbf16>, vector<32x128xf32> -> vector<32x128xf32>
    %c0_3 = arith.constant 0 : index
    %c0_4 = arith.constant 0 : index
    %3 = vector.load %arg3[%c0_3, %c0_4] : memref<32x1xf32, #tpu.memory_space<vmem>>, vector<32x1xf32>
    %4 = vector.broadcast %3 : vector<32x1xf32> to vector<32x128xf32>
    %5 = arith.addf %2, %4 : vector<32x128xf32>
    %6 = math.tanh %5 : vector<32x128xf32>
    %7 = arith.truncf %6 : vector<32x128xf32> to vector<32x128xbf16>
    %c0_5 = arith.constant 0 : index
    %c0_6 = arith.constant 0 : index
    %8 = vector.load %arg4[%c0_5, %c0_6] : memref<32x128xbf16, #tpu.memory_space<vmem>>, vector<32x128xbf16>
    tpu.vector_store %arg4[%c0_5, %c0_6], %7 {strides = array<i32>} : memref<32x128xbf16, #tpu.memory_space<vmem>>, vector<32x128xbf16>,
    return
  }
  func.func @transform_0(%arg0: i32) -> (i32, i32) {
    %c0_i32 = arith.constant 0 : i32
    %c0_i32_0 = arith.constant 0 : i32
    return %c0_i32, %arg0 : i32, i32
  }
  func.func @transform_1(%arg0: i32) -> (i32, i32) {
    %c0_i32 = arith.constant 0 : i32
    %c0_i32_0 = arith.constant 0 : i32
    %c0_i32_1 = arith.constant 0 : i32
    return %c0_i32, %c0_i32_0 : i32, i32
  }
  func.func @transform_2(%arg0: i32) -> (i32, i32) {
    %c0_i32 = arith.constant 0 : i32
    %c0_i32_0 = arith.constant 0 : i32
    %c0_i32_1 = arith.constant 0 : i32
    return %c0_i32, %c0_i32_0 : i32, i32
  }
  func.func @transform_3(%arg0: i32) -> (i32, i32) {
    %c0_i32 = arith.constant 0 : i32
    %c0_i32_0 = arith.constant 0 : i32
    return %c0_i32, %arg0 : i32, i32
  }
}

module attributes {stable_mosaic.version = 11 : i64} {
  func.func @rgcn_layer_kernel(%arg0: i32, %arg1: memref<32x128xbf16, #tpu.memory_space<vmem>>, %arg2: memref<32x128xbf16, #tpu.memory_space<vmem>>, %arg3: memref<256x128xbf16, #tpu.memory_space<vmem>>, %arg4: memref<64x32xbf16, #tpu.memory_space<vmem>>, %arg5: memref<32x32xbf16, #tpu.memory_space<vmem>>, %arg6: memref<32x1xf32, #tpu.memory_space<vmem>>, %arg7: memref<32x128xbf16, #tpu.memory_space<vmem>>) attributes {dimension_semantics = [#tpu.dimension_semantics<parallel>], iteration_bounds = array<i64: 1>, scalar_prefetch = 0 : i64, scratch_operands = 0 : i64, tpu.core_type = #tpu.core_type<tc>, window_params = [{pipeline_mode = #tpu.pipeline_mode<synchronous>, transform_indices = @transform_0, window_bounds = array<i64: 32, 128>}, {transform_indices = @transform_1, window_bounds = array<i64: 32, 128>}, {transform_indices = @transform_2, window_bounds = array<i64: 256, 128>}, {pipeline_mode = #tpu.pipeline_mode<synchronous>, transform_indices = @transform_3, window_bounds = array<i64: 64, 32>}, {pipeline_mode = #tpu.pipeline_mode<synchronous>, transform_indices = @transform_4, window_bounds = array<i64: 32, 32>}, {pipeline_mode = #tpu.pipeline_mode<synchronous>, transform_indices = @transform_5, window_bounds = array<i64: 32, 1>}, {transform_indices = @transform_6, window_bounds = array<i64: 32, 128>}]} {
    %c0 = arith.constant 0 : index
    %c0_0 = arith.constant 0 : index
    %0 = vector.load %arg4[%c0, %c0_0] : memref<64x32xbf16, #tpu.memory_space<vmem>>, vector<64x32xbf16>
    %c0_1 = arith.constant 0 : index
    %c0_2 = arith.constant 0 : index
    %1 = vector.load %arg1[%c0_1, %c0_2] : memref<32x128xbf16, #tpu.memory_space<vmem>>, vector<32x128xbf16>
    %cst = arith.constant dense<0.000000e+00> : vector<64x128xf32>
    %2 = tpu.matmul %0, %1, %cst {dimension_numbers = #tpu.dot_dimension_numbers<[1], [0], [0], [1], [0, 0, 1, 1], [], []>} : vector<64x32xbf16>, vector<32x128xbf16>, vector<64x128xf32> -> vector<64x128xf32>
    %3 = arith.truncf %2 : vector<64x128xf32> to vector<64x128xbf16>
    %4 = vector.extract_strided_slice %3 {offsets = [0, 0], sizes = [32, 128], strides = [1, 1]} : vector<64x128xbf16> to vector<32x128xbf16>
    %c0_3 = arith.constant 0 : index
    %c0_4 = arith.constant 0 : index
    %5 = vector.load %arg3[%c0_3, %c0_4] : memref<256x128xbf16, #tpu.memory_space<vmem>>, vector<128x128xbf16>
    %cst_5 = arith.constant dense<0.000000e+00> : vector<32x128xf32>
    %6 = tpu.matmul %4, %5, %cst_5 {dimension_numbers = #tpu.dot_dimension_numbers<[1], [0], [0], [1], [0, 0, 1, 1], [], []>} : vector<32x128xbf16>, vector<128x128xbf16>, vector<32x128xf32> -> vector<32x128xf32>
    %7 = vector.extract_strided_slice %3 {offsets = [32, 0], sizes = [32, 128], strides = [1, 1]} : vector<64x128xbf16> to vector<32x128xbf16>
    %c128 = arith.constant 128 : index
    %c0_6 = arith.constant 0 : index
    %8 = vector.load %arg3[%c128, %c0_6] : memref<256x128xbf16, #tpu.memory_space<vmem>>, vector<128x128xbf16>
    %cst_7 = arith.constant dense<0.000000e+00> : vector<32x128xf32>
    %9 = tpu.matmul %7, %8, %cst_7 {dimension_numbers = #tpu.dot_dimension_numbers<[1], [0], [0], [1], [0, 0, 1, 1], [], []>} : vector<32x128xbf16>, vector<128x128xbf16>, vector<32x128xf32> -> vector<32x128xf32>
    %10 = arith.addf %6, %9 : vector<32x128xf32>
    %c0_8 = arith.constant 0 : index
    %c0_9 = arith.constant 0 : index
    %11 = vector.load %arg5[%c0_8, %c0_9] : memref<32x32xbf16, #tpu.memory_space<vmem>>, vector<32x32xbf16>
    %c0_10 = arith.constant 0 : index
    %c0_11 = arith.constant 0 : index
    %12 = vector.load %arg2[%c0_10, %c0_11] : memref<32x128xbf16, #tpu.memory_space<vmem>>, vector<32x128xbf16>
    %cst_12 = arith.constant dense<0.000000e+00> : vector<32x128xf32>
    %13 = tpu.matmul %11, %12, %cst_12 {dimension_numbers = #tpu.dot_dimension_numbers<[1], [0], [0], [1], [0, 0, 1, 1], [], []>} : vector<32x32xbf16>, vector<32x128xbf16>, vector<32x128xf32> -> vector<32x128xf32>
    %14 = arith.addf %10, %13 : vector<32x128xf32>
    %c0_13 = arith.constant 0 : index
    %c0_14 = arith.constant 0 : index
    %15 = vector.load %arg6[%c0_13, %c0_14] : memref<32x1xf32, #tpu.memory_space<vmem>>, vector<32x1xf32>
    %16 = vector.broadcast %15 : vector<32x1xf32> to vector<32x128xf32>
    %17 = arith.addf %14, %16 : vector<32x128xf32>
    %18 = arith.truncf %17 : vector<32x128xf32> to vector<32x128xbf16>
    %c0_15 = arith.constant 0 : index
    %c0_16 = arith.constant 0 : index
    %19 = vector.load %arg7[%c0_15, %c0_16] : memref<32x128xbf16, #tpu.memory_space<vmem>>, vector<32x128xbf16>
    tpu.vector_store %arg7[%c0_15, %c0_16], %18 {strides = array<i32>} : memref<32x128xbf16, #tpu.memory_space<vmem>>, vector<32x128xbf16>,
    return
  }
  func.func @transform_0(%arg0: i32) -> (i32, i32) {
    %c0_i32 = arith.constant 0 : i32
    %c0_i32_0 = arith.constant 0 : i32
    %c0_i32_1 = arith.constant 0 : i32
    return %c0_i32, %c0_i32_0 : i32, i32
  }
  func.func @transform_1(%arg0: i32) -> (i32, i32) {
    %c0_i32 = arith.constant 0 : i32
    %c0_i32_0 = arith.constant 0 : i32
    return %c0_i32, %arg0 : i32, i32
  }
  func.func @transform_2(%arg0: i32) -> (i32, i32) {
    %c0_i32 = arith.constant 0 : i32
    %c0_i32_0 = arith.constant 0 : i32
    return %c0_i32, %arg0 : i32, i32
  }
  func.func @transform_3(%arg0: i32) -> (i32, i32) {
    %c0_i32 = arith.constant 0 : i32
    %c0_i32_0 = arith.constant 0 : i32
    %c0_i32_1 = arith.constant 0 : i32
    return %c0_i32, %c0_i32_0 : i32, i32
  }
  func.func @transform_4(%arg0: i32) -> (i32, i32) {
    %c0_i32 = arith.constant 0 : i32
    %c0_i32_0 = arith.constant 0 : i32
    %c0_i32_1 = arith.constant 0 : i32
    return %c0_i32, %c0_i32_0 : i32, i32
  }
  func.func @transform_5(%arg0: i32) -> (i32, i32) {
    %c0_i32 = arith.constant 0 : i32
    %c0_i32_0 = arith.constant 0 : i32
    %c0_i32_1 = arith.constant 0 : i32
    return %c0_i32, %c0_i32_0 : i32, i32
  }
  func.func @transform_6(%arg0: i32) -> (i32, i32) {
    %c0_i32 = arith.constant 0 : i32
    %c0_i32_0 = arith.constant 0 : i32
    return %c0_i32, %arg0 : i32, i32
  }
}

module attributes {stable_mosaic.version = 11 : i64} {
  func.func @rgcn_cls_kernel(%arg0: i32, %arg1: memref<32x128xbf16, #tpu.memory_space<vmem>>, %arg2: memref<32x128xbf16, #tpu.memory_space<vmem>>, %arg3: memref<256x128xbf16, #tpu.memory_space<vmem>>, %arg4: memref<64x32xbf16, #tpu.memory_space<vmem>>, %arg5: memref<32x32xbf16, #tpu.memory_space<vmem>>, %arg6: memref<32x1xf32, #tpu.memory_space<vmem>>, %arg7: memref<32x1xf32, #tpu.memory_space<vmem>>, %arg8: memref<1x1xf32, #tpu.memory_space<vmem>>, %arg9: memref<1x128xf32, #tpu.memory_space<vmem>>) attributes {dimension_semantics = [#tpu.dimension_semantics<parallel>], iteration_bounds = array<i64: 1>, scalar_prefetch = 0 : i64, scratch_operands = 0 : i64, tpu.core_type = #tpu.core_type<tc>, window_params = [{pipeline_mode = #tpu.pipeline_mode<synchronous>, transform_indices = @transform_0, window_bounds = array<i64: 32, 128>}, {transform_indices = @transform_1, window_bounds = array<i64: 32, 128>}, {transform_indices = @transform_2, window_bounds = array<i64: 256, 128>}, {pipeline_mode = #tpu.pipeline_mode<synchronous>, transform_indices = @transform_3, window_bounds = array<i64: 64, 32>}, {pipeline_mode = #tpu.pipeline_mode<synchronous>, transform_indices = @transform_4, window_bounds = array<i64: 32, 32>}, {pipeline_mode = #tpu.pipeline_mode<synchronous>, transform_indices = @transform_5, window_bounds = array<i64: 32, 1>}, {pipeline_mode = #tpu.pipeline_mode<synchronous>, transform_indices = @transform_6, window_bounds = array<i64: 32, 1>}, {pipeline_mode = #tpu.pipeline_mode<synchronous>, transform_indices = @transform_7, window_bounds = array<i64: 1, 1>}, {transform_indices = @transform_8, window_bounds = array<i64: 1, 128>}]} {
    %c0 = arith.constant 0 : index
    %c0_0 = arith.constant 0 : index
    %0 = vector.load %arg4[%c0, %c0_0] : memref<64x32xbf16, #tpu.memory_space<vmem>>, vector<64x32xbf16>
    %c0_1 = arith.constant 0 : index
    %c0_2 = arith.constant 0 : index
    %1 = vector.load %arg1[%c0_1, %c0_2] : memref<32x128xbf16, #tpu.memory_space<vmem>>, vector<32x128xbf16>
    %cst = arith.constant dense<0.000000e+00> : vector<64x128xf32>
    %2 = tpu.matmul %0, %1, %cst {dimension_numbers = #tpu.dot_dimension_numbers<[1], [0], [0], [1], [0, 0, 1, 1], [], []>} : vector<64x32xbf16>, vector<32x128xbf16>, vector<64x128xf32> -> vector<64x128xf32>
    %3 = arith.truncf %2 : vector<64x128xf32> to vector<64x128xbf16>
    %4 = vector.extract_strided_slice %3 {offsets = [0, 0], sizes = [32, 128], strides = [1, 1]} : vector<64x128xbf16> to vector<32x128xbf16>
    %c0_3 = arith.constant 0 : index
    %c0_4 = arith.constant 0 : index
    %5 = vector.load %arg3[%c0_3, %c0_4] : memref<256x128xbf16, #tpu.memory_space<vmem>>, vector<128x128xbf16>
    %cst_5 = arith.constant dense<0.000000e+00> : vector<32x128xf32>
    %6 = tpu.matmul %4, %5, %cst_5 {dimension_numbers = #tpu.dot_dimension_numbers<[1], [0], [0], [1], [0, 0, 1, 1], [], []>} : vector<32x128xbf16>, vector<128x128xbf16>, vector<32x128xf32> -> vector<32x128xf32>
    %7 = vector.extract_strided_slice %3 {offsets = [32, 0], sizes = [32, 128], strides = [1, 1]} : vector<64x128xbf16> to vector<32x128xbf16>
    %c128 = arith.constant 128 : index
    %c0_6 = arith.constant 0 : index
    %8 = vector.load %arg3[%c128, %c0_6] : memref<256x128xbf16, #tpu.memory_space<vmem>>, vector<128x128xbf16>
    %cst_7 = arith.constant dense<0.000000e+00> : vector<32x128xf32>
    %9 = tpu.matmul %7, %8, %cst_7 {dimension_numbers = #tpu.dot_dimension_numbers<[1], [0], [0], [1], [0, 0, 1, 1], [], []>} : vector<32x128xbf16>, vector<128x128xbf16>, vector<32x128xf32> -> vector<32x128xf32>
    %10 = arith.addf %6, %9 : vector<32x128xf32>
    %c0_8 = arith.constant 0 : index
    %c0_9 = arith.constant 0 : index
    %11 = vector.load %arg5[%c0_8, %c0_9] : memref<32x32xbf16, #tpu.memory_space<vmem>>, vector<32x32xbf16>
    %c0_10 = arith.constant 0 : index
    %c0_11 = arith.constant 0 : index
    %12 = vector.load %arg2[%c0_10, %c0_11] : memref<32x128xbf16, #tpu.memory_space<vmem>>, vector<32x128xbf16>
    %cst_12 = arith.constant dense<0.000000e+00> : vector<32x128xf32>
    %13 = tpu.matmul %11, %12, %cst_12 {dimension_numbers = #tpu.dot_dimension_numbers<[1], [0], [0], [1], [0, 0, 1, 1], [], []>} : vector<32x32xbf16>, vector<32x128xbf16>, vector<32x128xf32> -> vector<32x128xf32>
    %14 = arith.addf %10, %13 : vector<32x128xf32>
    %c0_13 = arith.constant 0 : index
    %c0_14 = arith.constant 0 : index
    %15 = vector.load %arg6[%c0_13, %c0_14] : memref<32x1xf32, #tpu.memory_space<vmem>>, vector<32x1xf32>
    %16 = vector.broadcast %15 : vector<32x1xf32> to vector<32x128xf32>
    %17 = arith.addf %14, %16 : vector<32x128xf32>
    %c0_15 = arith.constant 0 : index
    %c0_16 = arith.constant 0 : index
    %18 = vector.load %arg7[%c0_15, %c0_16] : memref<32x1xf32, #tpu.memory_space<vmem>>, vector<32x1xf32>
    %19 = vector.broadcast %18 : vector<32x1xf32> to vector<32x128xf32>
    %20 = arith.mulf %17, %19 : vector<32x128xf32>
    %cst_17 = arith.constant dense<0.000000e+00> : vector<128xf32>
    %21 = vector.multi_reduction <add>, %20, %cst_17 [0] : vector<32x128xf32> to vector<128xf32>
    %22 = vector.shape_cast %21 : vector<128xf32> to vector<1x128xf32>
    %c0_18 = arith.constant 0 : index
    %c0_19 = arith.constant 0 : index
    %23 = vector.load %arg8[%c0_18, %c0_19] : memref<1x1xf32, #tpu.memory_space<vmem>>, vector<1x1xf32>
    %24 = vector.broadcast %23 : vector<1x1xf32> to vector<1x128xf32>
    %25 = arith.addf %22, %24 : vector<1x128xf32>
    %26 = arith.negf %25 : vector<1x128xf32>
    %27 = math.exp %26 : vector<1x128xf32>
    %cst_20 = arith.constant 1.000000e+00 : f32
    %28 = vector.broadcast %cst_20 : f32 to vector<1x128xf32>
    %29 = arith.addf %28, %27 : vector<1x128xf32>
    %30 = arith.divf %28, %29 : vector<1x128xf32>
    %cst_21 = arith.constant 5.000000e+00 : f32
    %31 = vector.broadcast %cst_21 : f32 to vector<1x128xf32>
    %32 = arith.mulf %30, %31 : vector<1x128xf32>
    %33 = math.exp %32 : vector<1x128xf32>
    %c0_22 = arith.constant 0 : index
    %c0_23 = arith.constant 0 : index
    %34 = vector.load %arg9[%c0_22, %c0_23] : memref<1x128xf32, #tpu.memory_space<vmem>>, vector<1x128xf32>
    tpu.vector_store %arg9[%c0_22, %c0_23], %33 {strides = array<i32>} : memref<1x128xf32, #tpu.memory_space<vmem>>, vector<1x128xf32>,
    return
  }
  func.func @transform_0(%arg0: i32) -> (i32, i32) {
    %c0_i32 = arith.constant 0 : i32
    %c0_i32_0 = arith.constant 0 : i32
    %c0_i32_1 = arith.constant 0 : i32
    return %c0_i32, %c0_i32_0 : i32, i32
  }
  func.func @transform_1(%arg0: i32) -> (i32, i32) {
    %c0_i32 = arith.constant 0 : i32
    %c0_i32_0 = arith.constant 0 : i32
    return %c0_i32, %arg0 : i32, i32
  }
  func.func @transform_2(%arg0: i32) -> (i32, i32) {
    %c0_i32 = arith.constant 0 : i32
    %c0_i32_0 = arith.constant 0 : i32
    return %c0_i32, %arg0 : i32, i32
  }
  func.func @transform_3(%arg0: i32) -> (i32, i32) {
    %c0_i32 = arith.constant 0 : i32
    %c0_i32_0 = arith.constant 0 : i32
    %c0_i32_1 = arith.constant 0 : i32
    return %c0_i32, %c0_i32_0 : i32, i32
  }
  func.func @transform_4(%arg0: i32) -> (i32, i32) {
    %c0_i32 = arith.constant 0 : i32
    %c0_i32_0 = arith.constant 0 : i32
    %c0_i32_1 = arith.constant 0 : i32
    return %c0_i32, %c0_i32_0 : i32, i32
  }
  func.func @transform_5(%arg0: i32) -> (i32, i32) {
    %c0_i32 = arith.constant 0 : i32
    %c0_i32_0 = arith.constant 0 : i32
    %c0_i32_1 = arith.constant 0 : i32
    return %c0_i32, %c0_i32_0 : i32, i32
  }
  func.func @transform_6(%arg0: i32) -> (i32, i32) {
    %c0_i32 = arith.constant 0 : i32
    %c0_i32_0 = arith.constant 0 : i32
    %c0_i32_1 = arith.constant 0 : i32
    return %c0_i32, %c0_i32_0 : i32, i32
  }
  func.func @transform_7(%arg0: i32) -> (i32, i32) {
    %c0_i32 = arith.constant 0 : i32
    %c0_i32_0 = arith.constant 0 : i32
    %c0_i32_1 = arith.constant 0 : i32
    return %c0_i32, %c0_i32_0 : i32, i32
  }
  func.func @transform_8(%arg0: i32) -> (i32, i32) {
    %c0_i32 = arith.constant 0 : i32
    %c0_i32_0 = arith.constant 0 : i32
    return %c0_i32, %arg0 : i32, i32
  }
}

</mosaic_0001>

<bundles_post_ra>
// kernel: _device_forward.3
= control target key start
LH: loop header
LB: loop body
LE: loop exit
PB: predicated region body
PF: predicated region fallthrough
CT: control target
= control target key end

     0   :  { %v157_v1 = vmov 0   ;;  %vm69_vm0 = vcmask 261120   ;;  %s208_s0 = inlined_call_operand.vmem [shape: bf16[32,128], index: 0, kind: input, shape index: {}]   ;;  %s209_s2 = inlined_call_operand.vmem [shape: f32[32,1], index: 2, kind: input, shape index: {}]   ;;  %s210_s1 = inlined_call_operand.vmem [shape: bf16[32,32], index: 1, kind: input, shape index: {}]   ;;  %s211_s3 = inlined_call_operand.vmem [shape: bf16[32,128], index: 3, kind: output, shape index: {}]  }
   0x1   :  { %v132_v0 = vld [vmem:[%s208_s0 + $0x8] sm:$0xff]  ;;  %148 = vset.pattern.permute.xlu1 %v157_v1  ;;  %147 = vset.pattern.permute.xlu0 %v157_v1  ;;  %v25_v2 = vld [vmem:[%s209_s2 + $0x10] sm:$0xff]  ;;  %v23_v3 = vld [vmem:[%s209_s2] sm:$0xff] }
   0x2   :  { %82 = vmatpush.bf16.msra.mxu0 %v132_v0  ;;  %144 = vmatpush.bf16.msra.mxu1 %v132_v0  ;;  %v131_v4 = vld [vmem:[%s208_s0] sm:$0xff]  ;;  %v130_v6 = vld [vmem:[%s210_s1 + $0x8] sm:$0xff]  ;;  %v26_v7 = vld [vmem:[%s209_s2 + $0x18] sm:$0xff] }
   0x3   :  { %39 = vperm.xlu1 %148, %v25_v2   ;;  %29 = vperm.xlu0 %147, %v23_v3   ;;  %v129_v5 = vld [vmem:[%s210_s1] sm:$0xff]  ;;  %v24_v8 = vld [vmem:[%s209_s2 + $0x8] sm:$0xff] }
   0x6   :  { %83 = vmatpush.bf16.msra.mxu0 %v131_v4  ;;  %145 = vmatpush.bf16.msra.mxu1 %v131_v4 }
   0x9   :  { %127 = vmatmul.msk.bf16.vlgmr.msra.gmra.mxu0 %vm69_vm0, %v129_v5  ;;  %128 = vmatmul.msk.bf16.vlgmr.msra.gmra.mxu1 %vm69_vm0, %v130_v6 }
   0xb   :  { %44 = vperm.xlu1 %148, %v26_v7   ;;  %34 = vperm.xlu0 %147, %v24_v8  }
  0x75   :  { %v40_v9 = vpop.permute.xlu1 %39  ;;  %v30_v10 = vpop.permute.xlu0 %29 }
  0x7d   :  { %v45_v15 = vpop.permute.xlu1 %44  ;;  %v35_v16 = vpop.permute.xlu0 %34 }
  0x86   :  { %v85_v11 = vpop.f32.mrf.mxu0  ;;  %v90_v12 = vpop.f32.mrf.mxu1 }
  0x87   :  { %v86_v13 = vadd.f32 %v85_v11, %v30_v10  ;;  %v91_v14 = vadd.f32 %v90_v12, %v40_v9 }
  0x89   :  { %149 = vtanh.f32 %v86_v13 }
  0x8a   :  { %151 = vtanh.f32 %v91_v14 }
  0x8e   :  { %v87_v17 = vpop.f32.mrf.mxu0  ;;  %v92_v18 = vpop.f32.mrf.mxu1 }
  0x8f   :  { %v88_v19 = vadd.f32 %v87_v17, %v35_v16  ;;  %v93_v20 = vadd.f32 %v92_v18, %v45_v15  ;;  %v150_v21 = vpop.eup %149 }
  0x90   :  { %v152_v22 = vpop.eup %151 }
  0x91   :  { %153 = vtanh.f32 %v88_v19 }
  0x92   :  { %155 = vtanh.f32 %v93_v20 }
  0x97   :  { %v154_v23 = vpop.eup %153 }
  0x98   :  { %v156_v24 = vpop.eup %155  ;;  %v136_v25 = vpack.c.bf16 %v154_v23, %v150_v21 }
  0x99   :  { %v141_v26 = vpack.c.bf16 %v156_v24, %v152_v22 }
  0x9a   :  { %137 = vst [vmem:[%s211_s3] sm:$0xff] %v136_v25  }
  0x9b   :  { %143 = vst [vmem:[%s211_s3 + $0x8] sm:$0xff] %v141_v26  }

// kernel: _device_forward.4
= control target key start
LH: loop header
LB: loop body
LE: loop exit
PB: predicated region body
PF: predicated region fallthrough
CT: control target
= control target key end

     0   :  { %vm68_vm0 = vcmask 261120   ;;  %v557_v40 = vmov 0   ;;  %s695_s0 = inlined_call_operand.vmem [shape: bf16[32,128], index: 0, kind: input, shape index: {}, may-alias: {0,1}]   ;;  %s696_s3 = inlined_call_operand.vmem [shape: bf16[64,32], index: 3, kind: input, shape index: {}]   ;;  %s697_s2 = inlined_call_operand.vmem [shape: bf16[256,128], index: 2, kind: input, shape index: {}]   ;;  %s698_s1 = inlined_call_operand.vmem [shape: bf16[32,128], index: 1, kind: input, shape index: {}, may-alias: {0,1}]   ;;  %s699_s4 = inlined_call_operand.vmem [shape: bf16[32,32], index: 4, kind: input, shape index: {}]   ;;  %s700_s5 = inlined_call_operand.vmem [shape: f32[32,1], index: 5, kind: input, shape index: {}]   ;;  %s701_s6 = inlined_call_operand.vmem [shape: bf16[32,128], index: 6, kind: output, shape index: {}]  }
   0x1   :  { %v522_v0 = vld [vmem:[%s695_s0 + $0x8] sm:$0xff]  ;;  %v521_v1 = vld [vmem:[%s695_s0] sm:$0xff]  ;;  %v530_v4 = vld [vmem:[%s697_s2 + $0x38] sm:$0xff]  ;;  %555 = vset.pattern.permute.xlu0 %v557_v40  ;;  %556 = vset.pattern.permute.xlu1 %v557_v40 }
   0x2   :  { %87 = vmatpush.bf16.msra.mxu0 %v522_v0  ;;  %v517_v2 = vld [vmem:[%s696_s3] sm:$0xff]  ;;  %v518_v3 = vld [vmem:[%s696_s3 + $0x8] sm:$0xff]  ;;  %289 = vmatpush.bf16.msra.mxu2 %v530_v4  ;;  %v529_v5 = vld [vmem:[%s697_s2 + $0x30] sm:$0xff] }
   0x3   :  { %v528_v6 = vld [vmem:[%s697_s2 + $0x28] sm:$0xff]  ;;  %v527_v7 = vld [vmem:[%s697_s2 + $0x20] sm:$0xff]  ;;  %v519_v8 = vld [vmem:[%s696_s3 + $0x10] sm:$0xff] }
   0x4   :  { %v520_v9 = vld [vmem:[%s696_s3 + $0x18] sm:$0xff]  ;;  %v525_v11 = vld [vmem:[%s697_s2 + $0x10] sm:$0xff]  ;;  %v524_v12 = vld [vmem:[%s697_s2 + $0x8] sm:$0xff] }
   0x5   :  { %v526_v10 = vld [vmem:[%s697_s2 + $0x18] sm:$0xff]  ;;  %v523_v13 = vld [vmem:[%s697_s2] sm:$0xff]  ;;  %v537_v15 = vld [vmem:[%s697_s2 + $0x70] sm:$0xff] }
   0x6   :  { %88 = vmatpush.bf16.msra.mxu0 %v521_v1  ;;  %290 = vmatpush.bf16.msra.mxu2 %v529_v5  ;;  %v538_v14 = vld [vmem:[%s697_s2 + $0x78] sm:$0xff]  ;;  %v536_v16 = vld [vmem:[%s697_s2 + $0x68] sm:$0xff]  ;;  %v535_v17 = vld [vmem:[%s697_s2 + $0x60] sm:$0xff] }
   0x7   :  { %210 = vmatpush.bf16.msra.mxu1 %v538_v14  ;;  %v542_v18 = vld [vmem:[%s698_s1 + $0x8] sm:$0xff]  ;;  %v534_v19 = vld [vmem:[%s697_s2 + $0x58] sm:$0xff]  ;;  %v541_v20 = vld [vmem:[%s698_s1] sm:$0xff] }
   0x8   :  { %350 = vmatpush.bf16.msra.mxu3 %v542_v18  ;;  %v539_v22 = vld [vmem:[%s699_s4] sm:$0xff]  ;;  %v533_v23 = vld [vmem:[%s697_s2 + $0x50] sm:$0xff]  ;;  %v532_v24 = vld [vmem:[%s697_s2 + $0x48] sm:$0xff] }
   0x9   :  { %431 = vmatmul.msk.bf16.vlgmr.msra.gmra.mxu0 %vm68_vm0, %v517_v2  ;;  %v531_v28 = vld [vmem:[%s697_s2 + $0x40] sm:$0xff]  ;;  %v540_v33 = vld [vmem:[%s699_s4 + $0x8] sm:$0xff]  ;;  %v369_v42 = vld [vmem:[%s700_s5 + $0x10] sm:$0xff] }
   0xa   :  { %291 = vmatpush.bf16.msra.mxu2 %v528_v6  ;;  %v367_v39 = vld [vmem:[%s700_s5] sm:$0xff]  ;;  %383 = vperm.xlu1 %556, %v369_v42   ;;  %v368_v44 = vld [vmem:[%s700_s5 + $0x8] sm:$0xff]  ;;  %v370_v45 = vld [vmem:[%s700_s5 + $0x18] sm:$0xff] }
   0xb   :  { %211 = vmatpush.bf16.msra.mxu1 %v537_v15  ;;  %373 = vperm.xlu0 %555, %v367_v39  }
   0xc   :  { %351 = vmatpush.bf16.msra.mxu3 %v541_v20 }
   0xe   :  { %292 = vmatpush.bf16.msra.mxu2 %v527_v7 }
   0xf   :  { %212 = vmatpush.bf16.msra.mxu1 %v536_v16  ;;  %515 = vmatmul.msk.bf16.vlgmr.msra.gmra.mxu3 %vm68_vm0, %v539_v22 }
  0x12   :  { %293 = vmatpush.bf16.msra.mxu2 %v526_v10  ;;  %388 = vperm.xlu1 %556, %v370_v45  }
  0x13   :  { %213 = vmatpush.bf16.msra.mxu1 %v535_v17  ;;  %378 = vperm.xlu0 %555, %v368_v44  }
  0x16   :  { %294 = vmatpush.bf16.msra.mxu2 %v525_v11 }
  0x17   :  { %214 = vmatpush.bf16.msra.mxu1 %v534_v19 }
  0x19   :  { %432 = vmatmul.msk.bf16.gmra.mxu0 %vm68_vm0, %v518_v3 }
  0x1a   :  { %295 = vmatpush.bf16.msra.mxu2 %v524_v12 }
  0x1b   :  { %215 = vmatpush.bf16.msra.mxu1 %v533_v23 }
  0x1e   :  { %296 = vmatpush.bf16.msra.mxu2 %v523_v13 }
  0x1f   :  { %216 = vmatpush.bf16.msra.mxu1 %v532_v24  ;;  %516 = vmatmul.msk.bf16.gmra.mxu3 %vm68_vm0, %v540_v33 }
  0x23   :  { %217 = vmatpush.bf16.msra.mxu1 %v531_v28 }
  0x29   :  { %433 = vmatmul.msk.bf16.gmra.mxu0 %vm68_vm0, %v519_v8 }
  0x39   :  { %434 = vmatmul.msk.bf16.gmra.mxu0 %vm68_vm0, %v520_v9 }
  0x7c   :  { %v384_v13 = vpop.permute.xlu1 %383 }
  0x7d   :  { %v374_v62 = vpop.permute.xlu0 %373 }
  0x85   :  { %v379_v5 = vpop.permute.xlu0 %378 }
  0x86   :  { %v90_v21 = vpop.f32.mrf.mxu0 }
  0x87   :  { %v110_v25 = vpack.c.bf16 %v90_v21, %v90_v21  ;;  %v389_v21 = vpop.permute.xlu1 %388 }
  0x89   :  { %v233_v29 = vunpack.c.l.b16 %v110_v25 }
  0x8e   :  { %v92_v26 = vpop.f32.mrf.mxu0 }
  0x8f   :  { %v111_v27 = vpack.c.bf16 %v92_v26, %v92_v26 }
  0x91   :  { %v234_v30 = vunpack.c.l.b16 %v111_v27 }
  0x92   :  { %v353_v60 = vpop.f32.mrf.mxu3 }
  0x93   :  { %v237_v31 = vpack.c.b16 %v234_v30, %v233_v29 }
  0x95   :  { %297 = vmatmul.bf16.vlgmr.msra.gmra.mxu2 %v237_v31 }
  0x96   :  { %v95_v32 = vpop.f32.mrf.mxu0 }
  0x97   :  { %v112_v34 = vpack.c.bf16 %v95_v32, %v95_v32 }
  0x99   :  { %v235_v37 = vunpack.c.l.b16 %v112_v34 }
  0x9a   :  { %v355_v1 = vpop.f32.mrf.mxu3 }
  0x9e   :  { %v97_v35 = vpop.f32.mrf.mxu0 }
  0x9f   :  { %v113_v36 = vpack.c.bf16 %v97_v35, %v97_v35 }
  0xa1   :  { %v236_v38 = vunpack.c.l.b16 %v113_v36 }
  0xa2   :  { %v358_v11 = vpop.f32.mrf.mxu3 }
  0xa3   :  { %v238_v41 = vpack.c.b16 %v236_v38, %v235_v37 }
  0xa5   :  { %302 = vmatmul.bf16.gmra.mxu2 %v238_v41 }
  0xa6   :  { %v100_v43 = vpop.f32.mrf.mxu0 }
  0xa7   :  { %v114_v46 = vpack.c.bf16 %v100_v43, %v100_v43 }
  0xa9   :  { %v154_v49 = vunpack.c.l.b16 %v114_v46 }
  0xaa   :  { %v360_v19 = vpop.f32.mrf.mxu3 }
  0xae   :  { %v102_v47 = vpop.f32.mrf.mxu0 }
  0xaf   :  { %v115_v48 = vpack.c.bf16 %v102_v47, %v102_v47 }
  0xb1   :  { %v155_v50 = vunpack.c.l.b16 %v115_v48 }
  0xb3   :  { %v158_v51 = vpack.c.b16 %v155_v50, %v154_v49 }
  0xb5   :  { %218 = vmatmul.bf16.vlgmr.msra.gmra.mxu1 %v158_v51 }
  0xb6   :  { %v105_v52 = vpop.f32.mrf.mxu0 }
  0xb7   :  { %v116_v53 = vpack.c.bf16 %v105_v52, %v105_v52 }
  0xb9   :  { %v156_v56 = vunpack.c.l.b16 %v116_v53 }
  0xbe   :  { %v107_v54 = vpop.f32.mrf.mxu0 }
  0xbf   :  { %v117_v55 = vpack.c.bf16 %v107_v54, %v107_v54 }
  0xc1   :  { %v157_v57 = vunpack.c.l.b16 %v117_v55 }
  0xc3   :  { %v159_v58 = vpack.c.b16 %v157_v57, %v156_v56 }
  0xc5   :  { %223 = vmatmul.bf16.gmra.mxu1 %v159_v58 }
 0x118   :  { %v298_v59 = vpop.f32.mrf.mxu2 }
 0x120   :  { %v300_v63 = vpop.f32.mrf.mxu2 }
 0x128   :  { %v303_v9 = vpop.f32.mrf.mxu2 }
 0x130   :  { %v305_v15 = vpop.f32.mrf.mxu2 }
 0x132   :  { %v219_v61 = vpop.f32.mrf.mxu1 }
 0x133   :  { %v299_v0 = vadd.f32 %v298_v59, %v219_v61 }
 0x135   :  { %v363_v3 = vadd.f32 %v353_v60, %v299_v0 }
 0x137   :  { %v391_v7 = vadd.f32 %v374_v62, %v363_v3 }
 0x13a   :  { %v221_v2 = vpop.f32.mrf.mxu1 }
 0x13b   :  { %v301_v4 = vadd.f32 %v300_v63, %v221_v2 }
 0x13d   :  { %v364_v6 = vadd.f32 %v355_v1, %v301_v4 }
 0x13f   :  { %v392_v8 = vadd.f32 %v379_v5, %v364_v6 }
 0x141   :  { %v546_v10 = vpack.c.bf16 %v392_v8, %v391_v7 }
 0x142   :  { %v224_v12 = vpop.f32.mrf.mxu1 }
 0x143   :  { %547 = vst [vmem:[%s701_s6] sm:$0xff] %v546_v10   ;;  %v304_v14 = vadd.f32 %v303_v9, %v224_v12 }
 0x145   :  { %v365_v17 = vadd.f32 %v358_v11, %v304_v14 }
 0x147   :  { %v393_v22 = vadd.f32 %v384_v13, %v365_v17 }
 0x14a   :  { %v226_v16 = vpop.f32.mrf.mxu1 }
 0x14b   :  { %v306_v18 = vadd.f32 %v305_v15, %v226_v16 }
 0x14d   :  { %v366_v20 = vadd.f32 %v360_v19, %v306_v18 }
 0x14f   :  { %v394_v23 = vadd.f32 %v389_v21, %v366_v20 }
 0x151   :  { %v551_v24 = vpack.c.bf16 %v394_v23, %v393_v22 }
 0x153   :  { %553 = vst [vmem:[%s701_s6 + $0x8] sm:$0xff] %v551_v24  }

// kernel: _device_forward.5
= control target key start
LH: loop header
LB: loop body
LE: loop exit
PB: predicated region body
PF: predicated region fallthrough
CT: control target
= control target key end

     0   :  { %vm76_vm0 = vcmask 261120   ;;  %v622_v36 = vmov 0   ;;  %s782_s0 = inlined_call_operand.vmem [shape: bf16[32,128], index: 0, kind: input, shape index: {}, may-alias: {0,1}]   ;;  %s783_s3 = inlined_call_operand.vmem [shape: bf16[64,32], index: 3, kind: input, shape index: {}]   ;;  %s784_s2 = inlined_call_operand.vmem [shape: bf16[256,128], index: 2, kind: input, shape index: {}]   ;;  %s785_s1 = inlined_call_operand.vmem [shape: bf16[32,128], index: 1, kind: input, shape index: {}, may-alias: {0,1}]   ;;  %s786_s4 = inlined_call_operand.vmem [shape: bf16[32,32], index: 4, kind: input, shape index: {}]   ;;  %s787_s5 = inlined_call_operand.vmem [shape: f32[32,1], index: 5, kind: input, shape index: {}]   ;;  %s788_s6 = inlined_call_operand.vmem [shape: f32[32,1], index: 6, kind: input, shape index: {}]   ;;  %s789_s7 = inlined_call_operand.<no memory space> [shape: f32[1,1], index: 7, kind: input, shape index: {}]   ;;  %s790_s8 = inlined_call_operand.vmem [shape: f32[1,128], index: 8, kind: output, shape index: {}]  }
   0x1   :  { %v591_v0 = vld [vmem:[%s782_s0 + $0x8] sm:$0xff]  ;;  %v590_v1 = vld [vmem:[%s782_s0] sm:$0xff]  ;;  %v599_v4 = vld [vmem:[%s784_s2 + $0x38] sm:$0xff]  ;;  %613 = vset.pattern.permute.xlu0 %v622_v36  ;;  %614 = vset.pattern.permute.xlu1 %v622_v36  ;;  %v13_v45 = vstv %s789_s7 }
   0x2   :  { %95 = vmatpush.bf16.msra.mxu0 %v591_v0  ;;  %v586_v2 = vld [vmem:[%s783_s3] sm:$0xff]  ;;  %v587_v3 = vld [vmem:[%s783_s3 + $0x8] sm:$0xff]  ;;  %297 = vmatpush.bf16.msra.mxu2 %v599_v4  ;;  %v598_v5 = vld [vmem:[%s784_s2 + $0x30] sm:$0xff]  ;;  %14 = vst [vmem:[#allocation2] sm:$0x1] %v13_v45 }
   0x3   :  { %v597_v6 = vld [vmem:[%s784_s2 + $0x28] sm:$0xff]  ;;  %v596_v7 = vld [vmem:[%s784_s2 + $0x20] sm:$0xff]  ;;  %v588_v8 = vld [vmem:[%s783_s3 + $0x10] sm:$0xff]  ;;  %615 = vset.pattern.permute.xlu2 %v622_v36 }
   0x4   :  { %v589_v9 = vld [vmem:[%s783_s3 + $0x18] sm:$0xff]  ;;  %v594_v11 = vld [vmem:[%s784_s2 + $0x10] sm:$0xff]  ;;  %v593_v12 = vld [vmem:[%s784_s2 + $0x8] sm:$0xff] }
   0x5   :  { %v595_v10 = vld [vmem:[%s784_s2 + $0x18] sm:$0xff]  ;;  %v592_v13 = vld [vmem:[%s784_s2] sm:$0xff]  ;;  %v606_v15 = vld [vmem:[%s784_s2 + $0x70] sm:$0xff] }
   0x6   :  { %96 = vmatpush.bf16.msra.mxu0 %v590_v1  ;;  %298 = vmatpush.bf16.msra.mxu2 %v598_v5  ;;  %v607_v14 = vld [vmem:[%s784_s2 + $0x78] sm:$0xff]  ;;  %v605_v16 = vld [vmem:[%s784_s2 + $0x68] sm:$0xff]  ;;  %v604_v17 = vld [vmem:[%s784_s2 + $0x60] sm:$0xff] }
   0x7   :  { %218 = vmatpush.bf16.msra.mxu1 %v607_v14  ;;  %v611_v18 = vld [vmem:[%s785_s1 + $0x8] sm:$0xff]  ;;  %v603_v19 = vld [vmem:[%s784_s2 + $0x58] sm:$0xff]  ;;  %v610_v20 = vld [vmem:[%s785_s1] sm:$0xff] }
   0x8   :  { %358 = vmatpush.bf16.msra.mxu3 %v611_v18  ;;  %v608_v22 = vld [vmem:[%s786_s4] sm:$0xff]  ;;  %v602_v23 = vld [vmem:[%s784_s2 + $0x50] sm:$0xff]  ;;  %v601_v24 = vld [vmem:[%s784_s2 + $0x48] sm:$0xff] }
   0x9   :  { %499 = vmatmul.msk.bf16.vlgmr.msra.gmra.mxu0 %vm76_vm0, %v586_v2  ;;  %v600_v28 = vld [vmem:[%s784_s2 + $0x40] sm:$0xff]  ;;  %v609_v33 = vld [vmem:[%s786_s4 + $0x8] sm:$0xff]  ;;  %v377_v35 = vld [vmem:[%s787_s5 + $0x10] sm:$0xff] }
   0xa   :  { %299 = vmatpush.bf16.msra.mxu2 %v597_v6  ;;  %v375_v34 = vld [vmem:[%s787_s5] sm:$0xff]  ;;  %391 = vperm.xlu1 %614, %v377_v35   ;;  %v376_v42 = vld [vmem:[%s787_s5 + $0x8] sm:$0xff]  ;;  %v405_v48 = vld [vmem:[%s788_s6 + $0x10] sm:$0xff] }
   0xb   :  { %219 = vmatpush.bf16.msra.mxu1 %v606_v15  ;;  %381 = vperm.xlu0 %613, %v375_v34   ;;  %v403_v44 = vld [vmem:[%s788_s6] sm:$0xff]  ;;  %v404_v47 = vld [vmem:[%s788_s6 + $0x8] sm:$0xff]  ;;  %v406_v49 = vld [vmem:[%s788_s6 + $0x18] sm:$0xff] }
   0xc   :  { %359 = vmatpush.bf16.msra.mxu3 %v610_v20  ;;  %414 = vperm.xlu2 %615, %v404_v47   ;;  %v378_v50 = vld [vmem:[%s787_s5 + $0x18] sm:$0xff]  ;;  %v440_v57 = vld [vmem:[#allocation2] sm:$0x1] }
   0xe   :  { %300 = vmatpush.bf16.msra.mxu2 %v596_v7 }
   0xf   :  { %220 = vmatpush.bf16.msra.mxu1 %v605_v16  ;;  %583 = vmatmul.msk.bf16.vlgmr.msra.gmra.mxu3 %vm76_vm0, %v608_v22 }
  0x12   :  { %301 = vmatpush.bf16.msra.mxu2 %v595_v10  ;;  %409 = vperm.xlu1 %614, %v403_v44  }
  0x13   :  { %221 = vmatpush.bf16.msra.mxu1 %v604_v17  ;;  %386 = vperm.xlu0 %613, %v376_v42  }
  0x14   :  { %396 = vperm.xlu2 %615, %v378_v50  }
  0x16   :  { %302 = vmatpush.bf16.msra.mxu2 %v594_v11 }
  0x17   :  { %222 = vmatpush.bf16.msra.mxu1 %v603_v19 }
  0x19   :  { %500 = vmatmul.msk.bf16.gmra.mxu0 %vm76_vm0, %v587_v3 }
  0x1a   :  { %303 = vmatpush.bf16.msra.mxu2 %v593_v12  ;;  %424 = vperm.xlu1 %614, %v406_v49  }
  0x1b   :  { %223 = vmatpush.bf16.msra.mxu1 %v602_v23  ;;  %419 = vperm.xlu0 %613, %v405_v48  }
  0x1c   :  { %443 = vperm.xlu2 %615, %v440_v57  }
  0x1e   :  { %304 = vmatpush.bf16.msra.mxu2 %v592_v13 }
  0x1f   :  { %224 = vmatpush.bf16.msra.mxu1 %v601_v24  ;;  %584 = vmatmul.msk.bf16.gmra.mxu3 %vm76_vm0, %v609_v33 }
  0x23   :  { %225 = vmatpush.bf16.msra.mxu1 %v600_v28 }
  0x29   :  { %501 = vmatmul.msk.bf16.gmra.mxu0 %vm76_vm0, %v588_v8 }
  0x39   :  { %502 = vmatmul.msk.bf16.gmra.mxu0 %vm76_vm0, %v589_v9 }
  0x66   :  { %v415_v17 = vpop.permute.xlu2 %414 }
  0x6e   :  { %v397_v33 = vpop.permute.xlu2 %396 }
  0x76   :  { %v444_v44 = vpop.permute.xlu2 %443 }
  0x7c   :  { %v392_v8 = vpop.permute.xlu1 %391 }
  0x7d   :  { %v382_v5 = vpop.permute.xlu0 %381 }
  0x84   :  { %v410_v20 = vpop.permute.xlu1 %409 }
  0x85   :  { %v387_v12 = vpop.permute.xlu0 %386 }
  0x86   :  { %v98_v21 = vpop.f32.mrf.mxu0 }
  0x87   :  { %v118_v25 = vpack.c.bf16 %v98_v21, %v98_v21 }
  0x89   :  { %v241_v29 = vunpack.c.l.b16 %v118_v25 }
  0x8c   :  { %v425_v36 = vpop.permute.xlu1 %424 }
  0x8d   :  { %v420_v28 = vpop.permute.xlu0 %419 }
  0x8e   :  { %v100_v26 = vpop.f32.mrf.mxu0 }
  0x8f   :  { %v119_v27 = vpack.c.bf16 %v100_v26, %v100_v26 }
  0x91   :  { %v242_v30 = vunpack.c.l.b16 %v119_v27 }
  0x92   :  { %v361_v2 = vpop.f32.mrf.mxu3 }
  0x93   :  { %v245_v31 = vpack.c.b16 %v242_v30, %v241_v29 }
  0x95   :  { %305 = vmatmul.bf16.vlgmr.msra.gmra.mxu2 %v245_v31 }
  0x96   :  { %v103_v32 = vpop.f32.mrf.mxu0 }
  0x97   :  { %v120_v37 = vpack.c.bf16 %v103_v32, %v103_v32 }
  0x99   :  { %v243_v40 = vunpack.c.l.b16 %v120_v37 }
  0x9a   :  { %v363_v6 = vpop.f32.mrf.mxu3 }
  0x9e   :  { %v105_v38 = vpop.f32.mrf.mxu0 }
  0x9f   :  { %v121_v39 = vpack.c.bf16 %v105_v38, %v105_v38 }
  0xa1   :  { %v244_v41 = vunpack.c.l.b16 %v121_v39 }
  0xa2   :  { %v366_v13 = vpop.f32.mrf.mxu3 }
  0xa3   :  { %v246_v43 = vpack.c.b16 %v244_v41, %v243_v40 }
  0xa5   :  { %310 = vmatmul.bf16.gmra.mxu2 %v246_v43 }
  0xa6   :  { %v108_v46 = vpop.f32.mrf.mxu0 }
  0xa7   :  { %v122_v51 = vpack.c.bf16 %v108_v46, %v108_v46  ;;  %v446_v46 = vperm.slane %v444_v44, 0 }
  0xa9   :  { %v162_v54 = vunpack.c.l.b16 %v122_v51 }
  0xaa   :  { %v368_v29 = vpop.f32.mrf.mxu3 }
  0xae   :  { %v110_v52 = vpop.f32.mrf.mxu0 }
  0xaf   :  { %v123_v53 = vpack.c.bf16 %v110_v52, %v110_v52 }
  0xb1   :  { %v163_v55 = vunpack.c.l.b16 %v123_v53 }
  0xb3   :  { %v166_v56 = vpack.c.b16 %v163_v55, %v162_v54 }
  0xb5   :  { %226 = vmatmul.bf16.vlgmr.msra.gmra.mxu1 %v166_v56 }
  0xb6   :  { %v113_v58 = vpop.f32.mrf.mxu0 }
  0xb7   :  { %v124_v59 = vpack.c.bf16 %v113_v58, %v113_v58 }
  0xb9   :  { %v164_v62 = vunpack.c.l.b16 %v124_v59 }
  0xbe   :  { %v115_v60 = vpop.f32.mrf.mxu0 }
  0xbf   :  { %v125_v61 = vpack.c.bf16 %v115_v60, %v115_v60 }
  0xc1   :  { %v165_v63 = vunpack.c.l.b16 %v125_v61 }
  0xc3   :  { %v167_v0 = vpack.c.b16 %v165_v63, %v164_v62 }
  0xc5   :  { %231 = vmatmul.bf16.gmra.mxu1 %v167_v0 }
 0x118   :  { %v306_v1 = vpop.f32.mrf.mxu2 }
 0x120   :  { %v308_v4 = vpop.f32.mrf.mxu2 }
 0x128   :  { %v311_v10 = vpop.f32.mrf.mxu2 }
 0x130   :  { %v313_v24 = vpop.f32.mrf.mxu2 }
 0x132   :  { %v227_v3 = vpop.f32.mrf.mxu1 }
 0x133   :  { %v307_v11 = vadd.f32 %v306_v1, %v227_v3 }
 0x135   :  { %v371_v18 = vadd.f32 %v361_v2, %v307_v11 }
 0x137   :  { %v399_v22 = vadd.f32 %v382_v5, %v371_v18 }
 0x139   :  { %v427_v30 = vmul.f32 %v410_v20, %v399_v22 }
 0x13a   :  { %v229_v7 = vpop.f32.mrf.mxu1 }
 0x13b   :  { %v309_v9 = vadd.f32 %v308_v4, %v229_v7 }
 0x13d   :  { %v372_v15 = vadd.f32 %v363_v6, %v309_v9 }
 0x13f   :  { %v400_v21 = vadd.f32 %v387_v12, %v372_v15 }
 0x141   :  { %v428_v26 = vmul.f32 %v415_v17, %v400_v21 }
 0x142   :  { %v232_v14 = vpop.f32.mrf.mxu1 }
 0x143   :  { %v312_v16 = vadd.f32 %v311_v10, %v232_v14  ;;  %v431_v34 = vadd.f32 %v428_v26, %v427_v30 }
 0x145   :  { %v373_v19 = vadd.f32 %v366_v13, %v312_v16 }
 0x147   :  { %v401_v23 = vadd.f32 %v392_v8, %v373_v19 }
 0x149   :  { %v429_v31 = vmul.f32 %v420_v28, %v401_v23 }
 0x14a   :  { %v234_v25 = vpop.f32.mrf.mxu1 }
 0x14b   :  { %v314_v27 = vadd.f32 %v313_v24, %v234_v25  ;;  %v432_v37 = vadd.f32 %v431_v34, %v429_v31 }
 0x14d   :  { %v374_v32 = vadd.f32 %v368_v29, %v314_v27 }
 0x14f   :  { %v402_v35 = vadd.f32 %v397_v33, %v374_v32 }
 0x151   :  { %v430_v38 = vmul.f32 %v425_v36, %v402_v35 }
 0x153   :  { %v433_v39 = vadd.f32 %v432_v37, %v430_v38 }
 0x155   :  { %v434_v40 = vrot.slane %v433_v39, 4 }
 0x157   :  { %v435_v41 = vadd.f32 %v434_v40, %v433_v39 }
 0x159   :  { %v436_v42 = vrot.slane %v435_v41, 2 }
 0x15b   :  { %v437_v43 = vadd.f32 %v436_v42, %v435_v41 }
 0x15d   :  { %v438_v45 = vrot.slane %v437_v43, 1 }
 0x15f   :  { %v439_v47 = vadd.f32 %v438_v45, %v437_v43 }
 0x161   :  { %v447_v48 = vadd.f32 %v446_v46, %v439_v47 }
 0x163   :  { %v585_v49 = vmul.f32 -1.442695, %v447_v48 }
 0x165   :  { %616 = vpow2.f32 %v585_v49 }
 0x16b   :  { %v617_v50 = vpop.eup %616 }
 0x16c   :  { %v451_v51 = vadd.f32 1.0, %v617_v50 }
 0x16e   :  { %618 = vrcp.f32 %v451_v51  ;;  %v463_v55 = vand.u32 2147483648, %v451_v51  ;;  %v461_v57 = vand.u32 2147483647, %v451_v51  ;;  %vm457_vm2 = vweird.f32 %v451_v51 }
 0x170   :  { %v464_v59 = vor.u32 1.1754944e-38, %v463_v55  ;;  %vm462_vm4 = vcmp.eq.f32.partialorder %v461_v57, 8.507059e+37 }
 0x174   :  { %v619_v52 = vpop.eup %618 }
 0x175   :  { %v453_v53 = vmul.f32 %v619_v52, %v451_v51  ;;  %vm458_vm1 = vweird.f32 %v619_v52 }
 0x176   :  { %vm459_vm3 = vmor %vm457_vm2, %vm458_vm1 }
 0x177   :  { %v454_v54 = vsub.f32 1.0, %v453_v53 }
 0x179   :  { %v455_v56 = vmul.f32 %v619_v52, %v454_v54 }
 0x17b   :  { %v456_v58 = vadd.f32 %v619_v52, %v455_v56 }
 0x17d   :  { %v460_v60 = vsel %vm459_vm3, %v619_v52, %v456_v58 }
 0x17e   :  { %v465_v61 = vsel %vm462_vm4, %v464_v59, %v460_v60 }
 0x17f   :  { %v467_v62 = vmul.f32 5.0, %v465_v61 }
 0x181   :  { %v468_v63 = vmul.f32 1.442695, %v467_v62 }
 0x183   :  { %620 = vpow2.f32 %v468_v63 }
 0x189   :  { %v621_v0 = vpop.eup %620 }
 0x18a   :  { %470 = vst [vmem:[%s790_s8] sm:$0x1] %v621_v0 }

</bundles_post_ra>
